<compile_context>
chip_gen: v5e
topology: v5e:2x2
jax: 0.10.0
libtpu: 0.0.40
codegen_flags: <defaults>
</compile_context>

<pallas_src>
import jax
import jax.numpy as jnp
from jax import lax
from jax.experimental import pallas as pl
from jax.experimental.pallas import tpu as pltpu

LANE = 128            # lane-dense width used for the hidden / class dims
HID = 64              # GCNConv(1, 64)
OUT_F = 2             # GCNConv(64, 2)

# packed-parameter layout (rows 8-aligned so in-kernel sublane slices stay clean)
P_W1_ROW = 0          # row 0      : W1 row  (64 real lanes, rest 0)
P_B1_ROW = 8          # row 8      : b1      (64 real lanes, rest 0)
P_B2_ROW = 16         # row 16     : b2      (2 real lanes, rest 0)
P_W2_ROW = 24         # rows 24:152: W2 zero-padded to [128, 128]
P_ROWS = P_W2_ROW + LANE


def gcn_kernel(adj_ref, xd_ref, p_ref, o_ref):
    """adj_ref: [N,N] bf16 raw (A+I) adjacency (0/1, aggregation at row node).
       xd_ref : [N,2] f32, col0 = d^-1/2 * x, col1 = d^-1/2.
       p_ref  : [152,128] f32 packed parameters (layout above).
       o_ref  : [1,128] f32, lanes 0:2 = mean over nodes of log_softmax(z)."""
    adj = adj_ref[...]                                   # [N,N] bf16
    xd = xd_ref[...]                                     # [N,2] f32
    xs = xd[:, 0:1]                                      # d^-1/2 * x   [N,1]
    dinv = xd[:, 1:2]                                    # d^-1/2       [N,1]

    w1_row = p_ref[pl.ds(P_W1_ROW, 1), :]                # [1,128]
    b1 = p_ref[pl.ds(P_B1_ROW, 1), :]                    # [1,128]
    b2 = p_ref[pl.ds(P_B2_ROW, 1), :]                    # [1,128]
    w2 = p_ref[pl.ds(P_W2_ROW, LANE), :]                 # [128,128] zero-padded

    n = adj.shape[0]

    # ---- layer 1: D^-1/2 (A+I) D^-1/2 x W1 + b1 ------------------------------
    # aggregate the 1-wide feature on the MXU, expand to 64 lanes on the VPU.
    t = jnp.dot(adj, xs.astype(jnp.bfloat16),
                preferred_element_type=jnp.float32)      # [N,1]
    t = t * dinv                                         # post-agg row scale
    h = t * w1_row + b1                                  # [N,128] (lanes 64: = 0)
    h = jnp.maximum(h, 0.0)                              # relu, f32 VPU

    # ---- layer 2: D^-1/2 (A+I) ((D^-1/2 h) W2) + b2 (FLOP-minimal order) -----
    hs = (h * dinv).astype(jnp.bfloat16)                 # [N,128]
    hw = jnp.dot(hs, w2.astype(jnp.bfloat16),
                 preferred_element_type=jnp.float32)     # [N,128] (lanes 2: = 0)
    u = jnp.dot(adj, hw.astype(jnp.bfloat16),
                preferred_element_type=jnp.float32)      # [N,128]
    z = u * dinv + b2                                     # [N,128]

    # ---- log_softmax over the class dim (lanes); padded lanes masked out -----
    lane = lax.broadcasted_iota(jnp.int32, (n, LANE), 1)
    valid = lane < OUT_F
    zm = jnp.where(valid, z, jnp.float32(-1e30))
    m = jnp.max(zm, axis=1, keepdims=True)               # XLU lane reduce
    s = zm - m
    lse = jnp.log(jnp.sum(jnp.exp(s), axis=1, keepdims=True))
    logp = jnp.where(valid, s - lse, 0.0)                 # [N,128]

    # ---- mean over nodes (dim 0) -> lane-dense [1,128] store -----------------
    o_ref[...] = jnp.mean(logp, axis=0, keepdims=True)


def gcn_forward(x, edge_index, w1, b1, w2, b2):
    """x: [N,1] float node features; edge_index: [2,E] int32 (row0=src, row1=dst)."""
    n = x.shape[0]
    src = edge_index[0]
    dst = edge_index[1]

    # raw (A + I): aggregation at target node.  scatter-max keeps entries 0/1
    # even if edge_index already contains self-loops / duplicate edges, and
    # jnp.maximum with eye adds only the *missing* self-loops (PyG gcn_norm
    # add_remaining_self_loops semantics).
    adj = jnp.zeros((n, n), jnp.float32).at[dst, src].max(1.0)
    adj = jnp.maximum(adj, jnp.eye(n, dtype=jnp.float32))
    deg = jnp.sum(adj, axis=1)
    d_inv_sqrt = jnp.where(deg > 0, lax.rsqrt(deg), 0.0)

    # pack x and d^-1/2 into one [N,2] f32 input
    x_col = x.astype(jnp.float32).reshape(n, 1)
    d_col = d_inv_sqrt.reshape(n, 1).astype(jnp.float32)
    xd = jnp.concatenate([x_col * d_col, d_col], axis=1)

    # pack all (tiny) parameters into one lane-dense [152,128] f32 input
    params = jnp.zeros((P_ROWS, LANE), jnp.float32)
    params = params.at[P_W1_ROW, :HID].set(w1.reshape(-1).astype(jnp.float32))
    params = params.at[P_B1_ROW, :HID].set(b1.astype(jnp.float32))
    params = params.at[P_B2_ROW, :OUT_F].set(b2.astype(jnp.float32))
    params = params.at[P_W2_ROW:P_W2_ROW + HID, :OUT_F].set(
        w2.astype(jnp.float32))

    adj_bf16 = adj.astype(jnp.bfloat16)

    # TODO(synk): for large N, row-tile the adjacency in two passes
    # (pass 1: per-row-block (D^-1/2 H) W2; pass 2: row-tiled aggregation with a
    # "parallel" row axis) or replace the dense O(N^2) path with a
    # scalar-prefetch sparse gather over edge_index.
    out = pl.pallas_call(
        gcn_kernel,
        out_shape=jax.ShapeDtypeStruct((1, LANE), jnp.float32),
        in_specs=[pl.BlockSpec(adj_bf16.shape, lambda: (0, 0)),
                  pl.BlockSpec(xd.shape, lambda: (0, 0)),
                  pl.BlockSpec(params.shape, lambda: (0, 0))],
        out_specs=pl.BlockSpec((1, LANE), lambda: (0, 0)),
        compiler_params=pltpu.CompilerParams(
            vmem_limit_bytes=32 * 1024 * 1024),
    )(adj_bf16, xd, params)

    # lanes 0:2 hold the real classes -> [1, 2]
    return out[:, :OUT_F]


if __name__ == "__main__":
    key = jax.random.PRNGKey(0)
    k_x, k_w1, k_w2 = jax.random.split(key, 3)

    N = 8            # number of graph nodes
    IN_F = 1         # GCNConv(1, 64)

    # node features [N, 1]
    x = jax.random.normal(k_x, (N, IN_F), dtype=jnp.float32)

    # undirected ring graph: edges in both directions -> edge_index [2, 2N]
    idx = jnp.arange(N, dtype=jnp.int32)
    nxt = (idx + 1) % N
    src = jnp.concatenate([idx, nxt])
    dst = jnp.concatenate([nxt, idx])
    edge_index = jnp.stack([src, dst], axis=0)       # [2, 16]

    # deterministic parameters (GCNConv: weight [in, out], bias init zeros)
    w1 = jax.random.normal(k_w1, (IN_F, HID), dtype=jnp.float32) * 0.1
    b1 = jnp.zeros((HID,), jnp.float32)
    w2 = jax.random.normal(k_w2, (HID, OUT_F), dtype=jnp.float32) * 0.1
    b2 = jnp.zeros((OUT_F,), jnp.float32)

    out = gcn_forward(x, edge_index, w1, b1, w2, b2)
    jax.block_until_ready(out)
    assert out.shape == (1, OUT_F)
    print("KERNEL_OK")
</pallas_src>

<mosaic_0001>
module attributes {stable_mosaic.version = 11 : i64} {
  func.func @gcn_kernel(%arg0: memref<8x8xbf16, #tpu.memory_space<vmem>>, %arg1: memref<8x2xf32, #tpu.memory_space<vmem>>, %arg2: memref<152x128xf32, #tpu.memory_space<vmem>>, %arg3: memref<1x128xf32, #tpu.memory_space<vmem>>) attributes {dimension_semantics = [], scalar_prefetch = 0 : i64, scratch_operands = 0 : i64, tpu.core_type = #tpu.core_type<tc>} {
    %c0 = arith.constant 0 : index
    %c0_0 = arith.constant 0 : index
    %0 = vector.load %arg0[%c0, %c0_0] : memref<8x8xbf16, #tpu.memory_space<vmem>>, vector<8x8xbf16>
    %c0_1 = arith.constant 0 : index
    %c0_2 = arith.constant 0 : index
    %1 = vector.load %arg1[%c0_1, %c0_2] : memref<8x2xf32, #tpu.memory_space<vmem>>, vector<8x2xf32>
    %2 = vector.extract_strided_slice %1 {offsets = [0, 0], sizes = [8, 1], strides = [1, 1]} : vector<8x2xf32> to vector<8x1xf32>
    %3 = vector.extract_strided_slice %1 {offsets = [0, 1], sizes = [8, 1], strides = [1, 1]} : vector<8x2xf32> to vector<8x1xf32>
    %c0_3 = arith.constant 0 : index
    %c0_4 = arith.constant 0 : index
    %4 = vector.load %arg2[%c0_3, %c0_4] : memref<152x128xf32, #tpu.memory_space<vmem>>, vector<1x128xf32>
    %c8 = arith.constant 8 : index
    %c0_5 = arith.constant 0 : index
    %5 = vector.load %arg2[%c8, %c0_5] : memref<152x128xf32, #tpu.memory_space<vmem>>, vector<1x128xf32>
    %c16 = arith.constant 16 : index
    %c0_6 = arith.constant 0 : index
    %6 = vector.load %arg2[%c16, %c0_6] : memref<152x128xf32, #tpu.memory_space<vmem>>, vector<1x128xf32>
    %c24 = arith.constant 24 : index
    %c0_7 = arith.constant 0 : index
    %7 = vector.load %arg2[%c24, %c0_7] : memref<152x128xf32, #tpu.memory_space<vmem>>, vector<128x128xf32>
    %8 = arith.truncf %2 : vector<8x1xf32> to vector<8x1xbf16>
    %cst = arith.constant dense<0.000000e+00> : vector<8x1xf32>
    %9 = tpu.matmul %0, %8, %cst {dimension_numbers = #tpu.dot_dimension_numbers<[1], [0], [0], [1], [0, 0, 1, 1], [], []>} : vector<8x8xbf16>, vector<8x1xbf16>, vector<8x1xf32> -> vector<8x1xf32>
    %10 = arith.mulf %9, %3 : vector<8x1xf32>
    %11 = vector.broadcast %10 : vector<8x1xf32> to vector<8x128xf32>
    %12 = vector.broadcast %4 : vector<1x128xf32> to vector<8x128xf32>
    %13 = arith.mulf %11, %12 : vector<8x128xf32>
    %14 = vector.broadcast %5 : vector<1x128xf32> to vector<8x128xf32>
    %15 = arith.addf %13, %14 : vector<8x128xf32>
    %cst_8 = arith.constant 0.000000e+00 : f32
    %16 = vector.broadcast %cst_8 : f32 to vector<8x128xf32>
    %17 = arith.maximumf %15, %16 : vector<8x128xf32>
    %18 = vector.broadcast %3 : vector<8x1xf32> to vector<8x128xf32>
    %19 = arith.mulf %17, %18 : vector<8x128xf32>
    %20 = arith.truncf %19 : vector<8x128xf32> to vector<8x128xbf16>
    %21 = arith.truncf %7 : vector<128x128xf32> to vector<128x128xbf16>
    %cst_9 = arith.constant dense<0.000000e+00> : vector<8x128xf32>
    %22 = tpu.matmul %20, %21, %cst_9 {dimension_numbers = #tpu.dot_dimension_numbers<[1], [0], [0], [1], [0, 0, 1, 1], [], []>} : vector<8x128xbf16>, vector<128x128xbf16>, vector<8x128xf32> -> vector<8x128xf32>
    %23 = arith.truncf %22 : vector<8x128xf32> to vector<8x128xbf16>
    %cst_10 = arith.constant dense<0.000000e+00> : vector<8x128xf32>
    %24 = tpu.matmul %0, %23, %cst_10 {dimension_numbers = #tpu.dot_dimension_numbers<[1], [0], [0], [1], [0, 0, 1, 1], [], []>} : vector<8x8xbf16>, vector<8x128xbf16>, vector<8x128xf32> -> vector<8x128xf32>
    %25 = vector.broadcast %3 : vector<8x1xf32> to vector<8x128xf32>
    %26 = arith.mulf %24, %25 : vector<8x128xf32>
    %27 = vector.broadcast %6 : vector<1x128xf32> to vector<8x128xf32>
    %28 = arith.addf %26, %27 : vector<8x128xf32>
    %29 = tpu.iota {dimensions = array<i32: 1>} : vector<8x128xi32>
    %c2_i32 = arith.constant 2 : i32
    %30 = vector.broadcast %c2_i32 : i32 to vector<8x128xi32>
    %31 = arith.cmpi slt, %29, %30 : vector<8x128xi32>
    %cst_11 = arith.constant -1.000000e+30 : f32
    %32 = vector.broadcast %cst_11 : f32 to vector<8x128xf32>
    %33 = arith.select %31, %28, %32 : vector<8x128xi1>, vector<8x128xf32>
    %cst_12 = arith.constant dense<0xFF800000> : vector<8xf32>
    %34 = vector.multi_reduction <maximumf>, %33, %cst_12 [1] : vector<8x128xf32> to vector<8xf32>
    %35 = vector.shape_cast %34 : vector<8xf32> to vector<8x1xf32>
    %36 = vector.broadcast %35 : vector<8x1xf32> to vector<8x128xf32>
    %37 = arith.subf %33, %36 : vector<8x128xf32>
    %38 = math.exp %37 : vector<8x128xf32>
    %cst_13 = arith.constant dense<0.000000e+00> : vector<8xf32>
    %39 = vector.multi_reduction <add>, %38, %cst_13 [1] : vector<8x128xf32> to vector<8xf32>
    %40 = vector.shape_cast %39 : vector<8xf32> to vector<8x1xf32>
    %41 = math.log %40 : vector<8x1xf32>
    %42 = vector.broadcast %41 : vector<8x1xf32> to vector<8x128xf32>
    %43 = arith.subf %37, %42 : vector<8x128xf32>
    %cst_14 = arith.constant 0.000000e+00 : f32
    %44 = vector.broadcast %cst_14 : f32 to vector<8x128xf32>
    %45 = arith.select %31, %43, %44 : vector<8x128xi1>, vector<8x128xf32>
    %cst_15 = arith.constant dense<0.000000e+00> : vector<128xf32>
    %46 = vector.multi_reduction <add>, %45, %cst_15 [0] : vector<8x128xf32> to vector<128xf32>
    %47 = vector.shape_cast %46 : vector<128xf32> to vector<1x128xf32>
    %cst_16 = arith.constant 8.000000e+00 : f32
    %48 = vector.broadcast %cst_16 : f32 to vector<1x128xf32>
    %49 = arith.divf %47, %48 : vector<1x128xf32>
    %c0_17 = arith.constant 0 : index
    %c0_18 = arith.constant 0 : index
    %50 = vector.load %arg3[%c0_17, %c0_18] : memref<1x128xf32, #tpu.memory_space<vmem>>, vector<1x128xf32>
    tpu.vector_store %arg3[%c0_17, %c0_18], %49 {strides = array<i32>} : memref<1x128xf32, #tpu.memory_space<vmem>>, vector<1x128xf32>,
    return
  }
}

</mosaic_0001>

<bundles_post_ra>
// kernel: tpu_custom_call.1
= control target key start
LH: loop header
LB: loop body
LE: loop exit
PB: predicated region body
PF: predicated region fallthrough
CT: control target
= control target key end

     0   :  { %8 = vsyncpa [#allocation3], 0  ;;  %s304_s0 = inlined_call_operand.vmem [shape: bf16[8,8], index: 0, kind: input, shape index: {}]   ;;  %s305_s1 = inlined_call_operand.vmem [shape: f32[8,2], index: 1, kind: input, shape index: {}]   ;;  %s306_s2 = inlined_call_operand.hbm [shape: f32[152,128], index: 2, kind: input, shape index: {}]   ;;  %s307_s3 = inlined_call_operand.hbm [shape: f32[1,128], index: 3, kind: output, shape index: {}]  }
   0x1   :  { %9 = vsyncpa [#allocation4], 0  ;;  %s18_s14 = sshll.u32 %s306_s2, 4  ;;  %s258_s15 = smov [#allocation2]   ;;  %s19_s14 = int_to_ptr.hbm [resolvable:$true] %s18_s14 }
   0x2   :  { %s20_s16 = sshll.u32 %s258_s15, 4  ;;  %s259_s17 = smov 128   ;;  %s21_s16 = int_to_ptr.vmem [resolvable:$true] %s20_s16 }
   0x3   :  { %s260_s18 = smov 8  }
   0x4   :  { %26 = dma.hbm_to_vmem [thread:$0]  %s19_s14, 2432, %s21_s16, [#allocation3], %s259_s17, %s259_s17, %s260_s18  }
   0x5   :  { %254 = dma.done.wait [#allocation3], 2432  }
   0x6   :  { %255 = vsyncadd [#allocation3], 4294964864  ;;  %v33_v0 = vld [vmem:[%s305_s1] sm:$0xff]  ;;  %vm58_vm0 = vcmask 1043456   ;;  %s261_s21 = smov 127   ;;  %vm54_vm1 = vcmask 64512   ;;  %v137_v47 = vlaneseq }
   0x7   :  { %v53_v1 = vpack.c.bf16 %v33_v0, %v33_v0  ;;  %76 = vrot.lane.b32.xlu0 %v33_v0, %s261_s21  ;;  %v32_v3 = vld [vmem:[%s304_s0] sm:$0xf]  ;;  %v262_v4 = vmov 0   ;;  %v263_v5 = vmov 1   ;;  %v51_v6 = vld [vmem:[#allocation2 + $0x88] sm:$0xff]  ;;  %v52_v7 = vld [vmem:[#allocation2 + $0x90] sm:$0xff] }
   0x8   :  { %194 = vset.pattern.permute.xlu0 %v262_v4  ;;  %195 = vset.pattern.permute.xlu1 %v263_v5  ;;  %v49_v8 = vld [vmem:[#allocation2 + $0x78] sm:$0xff]  ;;  %v103_v9 = vpack.c.bf16 %v52_v7, %v51_v6  ;;  %v50_v10 = vld [vmem:[#allocation2 + $0x80] sm:$0xff]  ;;  %v47_v12 = vld [vmem:[#allocation2 + $0x68] sm:$0xff]  ;;  %v138_v48 = vand.u32 127, %v137_v47  ;;  %v264_v59 = vmov 8.0   ;;  %s265_s0 = smov [#allocation5]  }
   0x9   :  { %v60_v2 = vsel %vm58_vm0, %v53_v1, 0  ;;  %91 = vperm.xlu1 %195, %v33_v0   ;;  %v102_v11 = vpack.c.bf16 %v50_v10, %v49_v8  ;;  %v48_v13 = vld [vmem:[#allocation2 + $0x70] sm:$0xff]  ;;  %v45_v15 = vld [vmem:[#allocation2 + $0x58] sm:$0xff]  ;;  %v46_v16 = vld [vmem:[#allocation2 + $0x60] sm:$0xff]  ;;  %s172_s1 = sshll.u32 %s265_s0, 4  ;;  %s174_s25 = sshll.u32 %s307_s3, 4  ;;  %s173_s1 = int_to_ptr.vmem [resolvable:$true] %s172_s1  ;;  %s175_s25 = int_to_ptr.hbm [resolvable:$true] %s174_s25 }
   0xa   :  { %69 = vmatpush.bf16.msra.mxu0 %v60_v2  ;;  %104 = vmatpush.bf16.msra.mxu1 %v103_v9  ;;  %v101_v14 = vpack.c.bf16 %v48_v13, %v47_v12  ;;  %v100_v17 = vpack.c.bf16 %v46_v16, %v45_v15  ;;  %v43_v18 = vld [vmem:[#allocation2 + $0x48] sm:$0xff]  ;;  %v44_v19 = vld [vmem:[#allocation2 + $0x50] sm:$0xff]  ;;  %v41_v21 = vld [vmem:[#allocation2 + $0x38] sm:$0xff]  ;;  %vm139_vm2 = vcmp.lt.s32.totalorder %v138_v48, 2 }
   0xb   :  { %v99_v20 = vpack.c.bf16 %v44_v19, %v43_v18  ;;  %v42_v22 = vld [vmem:[#allocation2 + $0x40] sm:$0xff]  ;;  %v39_v28 = vld [vmem:[#allocation2 + $0x28] sm:$0xff]  ;;  %v40_v29 = vld [vmem:[#allocation2 + $0x30] sm:$0xff] }
   0xc   :  { %v98_v23 = vpack.c.bf16 %v42_v22, %v41_v21  ;;  %v97_v30 = vpack.c.bf16 %v40_v29, %v39_v28  ;;  %v37_v31 = vld [vmem:[#allocation2 + $0x18] sm:$0xff]  ;;  %v38_v32 = vld [vmem:[#allocation2 + $0x20] sm:$0xff]  ;;  %v198_v35 = vld [vmem:[#allocation2 + $0x8] ss:$0 sm:$0xff] }
   0xd   :  { %184 = vmatmul.msk.bf16.vlgmr.msra.gmra.mxu0 %vm54_vm1, %v32_v3  ;;  %v96_v33 = vpack.c.bf16 %v38_v32, %v37_v31  ;;  %v197_v34 = vld [vmem:[#allocation2] ss:$0 sm:$0xff]  ;;  %v199_v49 = vld [vmem:[#allocation2 + $0x10] ss:$0 sm:$0xff] }
   0xe   :  { %105 = vmatpush.bf16.msra.mxu1 %v102_v11 }
  0x12   :  { %106 = vmatpush.bf16.msra.mxu1 %v101_v14 }
  0x16   :  { %107 = vmatpush.bf16.msra.mxu1 %v100_v17 }
  0x1a   :  { %108 = vmatpush.bf16.msra.mxu1 %v99_v20 }
  0x1e   :  { %109 = vmatpush.bf16.msra.mxu1 %v98_v23 }
  0x22   :  { %110 = vmatpush.bf16.msra.mxu1 %v97_v30 }
  0x26   :  { %111 = vmatpush.bf16.msra.mxu1 %v96_v33 }
  0x79   :  { %v77_v24 = vpop.permute.xlu0 %76 }
  0x7b   :  { %v92_v39 = vpop.permute.xlu1 %91 }
  0x8a   :  { %v71_v25 = vpop.f32.mrf.mxu0 }
  0x8b   :  { %v79_v26 = vmul.f32 %v77_v24, %v71_v25 }
  0x8d   :  { %82 = vperm.xlu0 %194, %v79_v26  }
  0x92   :  { %v73_v27 = vpop.f32.mrf.mxu0 }
  0x95   :  { %196 = vset.pattern.permute.xlu0 %v263_v5 }
  0xff   :  { %v83_v36 = vpop.permute.xlu0 %82 }
 0x100   :  { %v86_v37 = vmul.f32 %v197_v34, %v83_v36 }
 0x102   :  { %v88_v38 = vadd.f32 %v198_v35, %v86_v37 }
 0x104   :  { %v89_v40 = vmax.f32 %v88_v38, 0.0 }
 0x106   :  { %v94_v41 = vmul.f32 %v92_v39, %v89_v40 }
 0x108   :  { %v95_v42 = vpack.c.bf16 %v94_v41, %v94_v41 }
 0x10a   :  { %112 = vmatmul.bf16.vlgmr.msra.gmra.mxu1 %v95_v42 }
 0x187   :  { %v113_v43 = vpop.f32.mrf.mxu1 }
 0x188   :  { %v117_v44 = vpack.c.bf16 %v113_v43, %v113_v43 }
 0x18a   :  { %v119_v45 = vsel %vm58_vm0, %v117_v44, 0 }
 0x18b   :  { %128 = vmatpush.bf16.msra.mxu2 %v119_v45 }
 0x18e   :  { %185 = vmatmul.msk.bf16.vlgmr.msra.gmra.mxu2 %vm54_vm1, %v32_v3 }
 0x18f   :  { %v115_v46 = vpop.f32.mrf.mxu1 }
 0x211   :  { %v130_v50 = vpop.f32.mrf.mxu2 }
 0x212   :  { %v134_v51 = vmul.f32 %v130_v50, %v92_v39 }
 0x214   :  { %v136_v52 = vadd.f32 %v199_v49, %v134_v51 }
 0x216   :  { %v140_v53 = vsel %vm139_vm2, %v136_v52, -1e+30 }
 0x217   :  { %141 = vmax.xlane.f32.xlu1 %v140_v53 }
 0x219   :  { %v132_v54 = vpop.f32.mrf.mxu2 }
 0x28a   :  { %v142_v55 = vpop.xlane.xlu1 %141 }
 0x28b   :  { %v143_v56 = vsub.f32 %v140_v53, %v142_v55 }
 0x28d   :  { %v144_v57 = vmul.f32 1.442695, %v143_v56 }
 0x28f   :  { %200 = vpow2.f32 %v144_v57 }
 0x290   :  { %202 = vrcp.f32 %v264_v59 }
 0x295   :  { %v201_v58 = vpop.eup %200 }
 0x296   :  { %146 = vadd.xlane.f32.xlu2 %v201_v58  ;;  %v203_v61 = vpop.eup %202 }
 0x297   :  { %v159_v62 = vmul.f32 8.0, %v203_v61  ;;  %vm163_vm3 = vweird.f32 %v203_v61 }
 0x299   :  { %v160_v2 = vsub.f32 1.0, %v159_v62 }
 0x29b   :  { %v161_v5 = vmul.f32 %v203_v61, %v160_v2 }
 0x29d   :  { %v162_v8 = vadd.f32 %v203_v61, %v161_v5 }
 0x29f   :  { %v164_v11 = vsel %vm163_vm3, %v203_v61, %v162_v8 }
 0x309   :  { %v147_v60 = vpop.xlane.xlu2 %146 }
 0x30a   :  { %204 = vlog2.f32 %v147_v60 }
 0x310   :  { %v205_v63 = vpop.eup %204 }
 0x311   :  { %v149_v0 = vmul.f32 0.6931472, %v205_v63 }
 0x313   :  { %v150_v1 = vsub.f32 %v143_v56, %v149_v0 }
 0x315   :  { %v151_v3 = vsel %vm139_vm2, %v150_v1, 0.0 }
 0x316   :  { %v152_v4 = vrot.slane %v151_v3, 4 }
 0x318   :  { %v153_v6 = vadd.f32 %v152_v4, %v151_v3 }
 0x31a   :  { %v154_v7 = vrot.slane %v153_v6, 2 }
 0x31c   :  { %v155_v9 = vadd.f32 %v154_v7, %v153_v6 }
 0x31e   :  { %v156_v10 = vrot.slane %v155_v9, 1 }
 0x320   :  { %v157_v12 = vadd.f32 %v156_v10, %v155_v9 }
 0x322   :  { %v165_v13 = vmul.f32 %v164_v11, %v157_v12 }
 0x324   :  { %166 = vst [vmem:[#allocation5] sm:$0x1] %v165_v13 }
 0x325   :  { %177 = dma.vmem_to_hbm [thread:$0]  %s173_s1, 16, %s175_s25, [#allocation4]  }
 0x326   :  { %256 = dma.done.wait [#allocation4], 16  }
 0x327   :  { %257 = vsyncadd [#allocation4], 4294967280 }
 0x328   :  { %182 = vsyncpa [#allocation3], 1 }
 0x329   :  { %183 = vsyncpa [#allocation4], 1 }

</bundles_post_ra>
